<compile_context>
chip_gen: v5e
topology: v5e:2x2
jax: 0.10.0
libtpu: 0.0.40
codegen_flags: <defaults>
</compile_context>

<pallas_src>
import functools

import jax
import jax.numpy as jnp
from jax import lax
from jax.experimental import pallas as pl
from jax.experimental.pallas import tpu as pltpu


def _phde_kernel(x_ref, mfold_ref, wrk_ref, w1k_ref, w2k_ref, ca_ref, cb_ref,
                 rc_ref, o_ref, *, bt, C, T, W, HW):
    f32 = jnp.float32

    xblk = x_ref[...].astype(f32)                                   # (bt*C, HW)

    # ---- channel-mean of reduced features, folded through wr: one small matmul ----
    v = jnp.dot(mfold_ref[...], xblk, preferred_element_type=f32)   # (bt, HW)

    # ---- 5-point Laplacian (zero padding) via lane rolls + neighbour masks ----
    rowv = rc_ref[0:1, :]                                           # (1, HW) row index
    colv = rc_ref[1:2, :]                                           # (1, HW) col index
    shifts = (1, HW - 1, W, HW - W)
    masks = []
    for s in shifts:
        rr = pltpu.roll(rowv, s, axis=1)
        cc = pltpu.roll(colv, s, axis=1)
        nb = (jnp.abs(rr - rowv) + jnp.abs(cc - colv)) == 1.0       # fetched a true 4-neighbour?
        masks.append(jnp.where(nb, 1.0, 0.0).astype(f32))

    def lap(z):                                                     # z: (bt, HW)
        acc = -4.0 * z
        for s, m in zip(shifts, masks):
            acc = acc + pltpu.roll(z, s, axis=1) * m
        return acc

    v1 = lap(v)                                                     # L v
    v2 = lap(v1)                                                    # L^2 v

    # ---- global average pool + w_pred MLP, batched over the block (block-diag weights) ----
    xlm = jnp.sum(xblk, axis=1, keepdims=True) * (1.0 / HW)         # (bt*C, 1)
    wctx = jnp.dot(wrk_ref[...], xlm, preferred_element_type=f32)   # (bt*CR, 1)
    hid = jnp.maximum(jnp.dot(w1k_ref[...], wctx, preferred_element_type=f32), 0.0)
    logits = jnp.dot(w2k_ref[...], hid, preferred_element_type=f32)  # (bt*T, 1)

    ca = ca_ref[...]                                                # (T, 1) fuse_w * alpha (last row 0)
    cb = cb_ref[...]                                                # (T, 1) fuse_w * beta  (last row 0)

    # ---- per-image softmax over T, fused persistence gate, lane-dense store ----
    for b in range(bt):                                             # bt is small & static
        lg = logits[b * T:(b + 1) * T, :]                           # (T, 1)
        m = jnp.max(lg, axis=0, keepdims=True)
        e = jnp.exp(lg - m)
        s = jnp.sum(e, axis=0, keepdims=True)
        wsm = e * pl.reciprocal(s, approx=True)                     # softmax over diffusion times
        cfa = jnp.sum(ca * wsm, axis=0, keepdims=True)              # (1, 1)
        cfb = jnp.sum(cb * wsm, axis=0, keepdims=True)              # (1, 1)
        z = cfa * v1[b:b + 1, :] + cfb * v2[b:b + 1, :]             # fuse_w * weighted-P-sum, (1, HW)
        gate = 1.0 + pl.reciprocal(1.0 + jnp.exp(-z), approx=True)  # 1 + sigmoid
        lo = b * C
        o_ref[lo:lo + C, :] = (xblk[lo:lo + C, :] * gate).astype(o_ref.dtype)


def _pick_block_b(B, C, HW, itemsize, max_block_bytes=4 << 20):
    """Images per block: divides B, bt*C rows divisible by 8 (or full), fits a modest
    VMEM budget, and keeps >= 2 grid steps when possible (feeds both v7x TensorCores)."""
    cands = [bt for bt in range(1, B + 1)
             if B % bt == 0 and ((bt * C) % 8 == 0 or bt == B)]
    good = [bt for bt in cands if (bt * C) % 8 == 0]
    pool = good if good else cands
    fit = [bt for bt in pool if bt * C * HW * itemsize <= max_block_bytes]
    if not fit:
        return min(pool)
    bt = max(fit)
    if bt == B and B > 1:
        smaller = [b for b in fit if b < B]
        if smaller:
            bt = max(smaller)
    return bt


def phde_forward(x, wr, w1, w2, t_scale, fuse_w, *, block_b=None):
    """x: (B, C, H, W).  wr: (CR, C).  w1: (MID, CR).  w2: (T, MID).
    t_scale: (T,).  fuse_w: (1,).  Returns (B, C, H, W)."""
    B, C, H, W = x.shape
    CR = wr.shape[0]
    MID = w1.shape[0]
    T = t_scale.shape[0]
    HW = H * W
    f32 = jnp.float32

    if H < 3 or W < 3:
        raise ValueError("phde_forward requires H >= 3 and W >= 3 for the rolled 5-point stencil.")

    bt = _pick_block_b(B, C, HW, x.dtype.itemsize) if block_b is None else block_b
    assert B % bt == 0, "block_b must divide the batch size"
    rows_blk = bt * C

    x2 = x.reshape(B * C, HW)                                       # lane-dense 2-D layout

    wr32 = wr.astype(f32)
    eye_bt = jnp.eye(bt, dtype=f32)
    wrm = jnp.mean(wr32, axis=0, keepdims=True)                     # (1, C): channel-mean of wr rows
    mfold = jnp.kron(eye_bt, wrm)                                   # (bt, bt*C)
    wrk = jnp.kron(eye_bt, wr32)                                    # (bt*CR, bt*C)
    w1k = jnp.kron(eye_bt, w1.astype(f32))                          # (bt*MID, bt*CR)
    w2k = jnp.kron(eye_bt, w2.astype(f32))                          # (bt*T, bt*MID)

    tsf = t_scale.astype(f32)
    fw = jnp.reshape(fuse_w, ()).astype(f32)
    alphas = tsf[:-1] - tsf[1:]                                     # t_j - t_{j+1}
    betas = 0.5 * (tsf[1:] * tsf[1:] - tsf[:-1] * tsf[:-1])         # 0.5 (t_{j+1}^2 - t_j^2)
    coefa = jnp.zeros((T, 1), f32).at[:T - 1, 0].set(fw * alphas)   # fuse weight folded in
    coefb = jnp.zeros((T, 1), f32).at[:T - 1, 0].set(fw * betas)

    idx = jnp.arange(HW, dtype=jnp.int32)
    rc = jnp.stack([(idx // W).astype(f32), (idx % W).astype(f32)], axis=0)   # (2, HW)

    kernel = functools.partial(_phde_kernel, bt=bt, C=C, T=T, W=W, HW=HW)
    const = lambda i: (0, 0)

    out2 = pl.pallas_call(
        kernel,
        out_shape=jax.ShapeDtypeStruct((B * C, HW), x.dtype),
        grid=(B // bt,),
        in_specs=[
            pl.BlockSpec((rows_blk, HW), lambda i: (i, 0)),         # x block (lane dense)
            pl.BlockSpec((bt, rows_blk), const),                    # mean-fold matrix   (resident)
            pl.BlockSpec((bt * CR, rows_blk), const),               # kron(I, wr)        (resident)
            pl.BlockSpec((bt * MID, bt * CR), const),               # kron(I, w1)        (resident)
            pl.BlockSpec((bt * T, bt * MID), const),                # kron(I, w2)        (resident)
            pl.BlockSpec((T, 1), const),                            # fuse*alpha         (resident)
            pl.BlockSpec((T, 1), const),                            # fuse*beta          (resident)
            pl.BlockSpec((2, HW), const),                           # row/col index rows (resident)
        ],
        out_specs=pl.BlockSpec((rows_blk, HW), lambda i: (i, 0)),
        compiler_params=pltpu.CompilerParams(
            dimension_semantics=("parallel",),
            vmem_limit_bytes=32 * 1024 * 1024),
    )(x2, mfold, wrk, w1k, w2k, coefa, coefb, rc)

    return out2.reshape(B, C, H, W)


def phde_reference(x, wr, w1, w2, t_scale, fuse_w):
    """Pure-JAX reference matching the PyTorch forward (for validation)."""
    hi = lax.Precision.HIGHEST
    CR = wr.shape[0]
    T = t_scale.shape[0]
    y = jnp.einsum('oc,bchw->bohw', wr, x, precision=hi)
    lap_k = jnp.array([[0., 1., 0.], [1., -4., 1.], [0., 1., 0.]], jnp.float32)
    dw = jnp.tile(lap_k[None, None], (CR, 1, 1, 1))                 # (CR, 1, 3, 3)

    def dw_lap(z):
        return lax.conv_general_dilated(
            z, dw, window_strides=(1, 1), padding=[(1, 1), (1, 1)],
            dimension_numbers=('NCHW', 'OIHW', 'NCHW'),
            feature_group_count=CR, precision=hi)

    feats = []
    for i in range(T):
        t = t_scale[i]
        y1 = dw_lap(y)
        y2 = dw_lap(y1)
        feats.append(y - t * y1 + 0.5 * (t * t) * y2)
    Hst = jnp.stack(feats, axis=1)                                  # (B, T, CR, H, W)
    P = (Hst[:, 1:] - Hst[:, :-1]).mean(axis=2)                     # (B, T-1, H, W)
    wctx = y.mean(axis=(2, 3))                                      # (B, CR)
    hidden = jnp.maximum(jnp.einsum('bc,mc->bm', wctx, w1, precision=hi), 0.0)
    logits = jnp.einsum('bm,tm->bt', hidden, w2, precision=hi)
    wsm = jax.nn.softmax(logits, axis=1)[:, :T - 1]                 # (B, T-1)
    wps = jnp.sum(P * wsm[:, :, None, None], axis=1, keepdims=True)
    a = jax.nn.sigmoid(fuse_w.reshape(()) * wps)
    return x * (1.0 + a)


if __name__ == "__main__":
    key = jax.random.PRNGKey(0)
    kx, k1, k2, k3, k4 = jax.random.split(key, 5)

    B, C, H, W = 2, 4, 16, 16
    r = 4
    CR = max(8, C // r)              # 8
    MID = max(8, CR // 2)            # 8
    times = (0.5, 1.0, 2.0)
    T = len(times)

    x = jax.random.normal(kx, (B, C, H, W), jnp.float32)
    wr = jax.random.normal(k1, (CR, C), jnp.float32) * 0.25    # reduce 1x1 conv weight
    w1 = jax.random.normal(k2, (MID, CR), jnp.float32) * 0.25  # w_pred conv1 weight
    w2 = jax.random.normal(k3, (T, MID), jnp.float32) * 0.25   # w_pred conv2 weight
    fuse_w = jax.random.normal(k4, (1,), jnp.float32) * 0.5    # fuse 1x1 conv weight
    t_scale = jnp.asarray(times, jnp.float32)                  # learnable times (init)

    out = jax.block_until_ready(phde_forward(x, wr, w1, w2, t_scale, fuse_w))
    ref = jax.block_until_ready(phde_reference(x, wr, w1, w2, t_scale, fuse_w))

    assert out.shape == (B, C, H, W) and out.dtype == jnp.float32
    err = float(jnp.max(jnp.abs(out - ref)))
    # Tolerance budgets for default-precision MXU passes on the tiny dots and the
    # approx (EUP) reciprocals; the Laplacian stencil itself is exact f32.
    if err > 2e-2:
        raise AssertionError(f"mismatch vs reference: max abs err {err}")
    print("KERNEL_OK")
</pallas_src>

<mosaic_0001>
module attributes {stable_mosaic.version = 11 : i64} {
  func.func @_phde_kernel(%arg0: i32, %arg1: memref<8x256xf32, #tpu.memory_space<vmem>>, %arg2: memref<2x8xf32, #tpu.memory_space<vmem>>, %arg3: memref<16x8xf32, #tpu.memory_space<vmem>>, %arg4: memref<16x16xf32, #tpu.memory_space<vmem>>, %arg5: memref<6x16xf32, #tpu.memory_space<vmem>>, %arg6: memref<3x1xf32, #tpu.memory_space<vmem>>, %arg7: memref<3x1xf32, #tpu.memory_space<vmem>>, %arg8: memref<2x256xf32, #tpu.memory_space<vmem>>, %arg9: memref<8x256xf32, #tpu.memory_space<vmem>>) attributes {dimension_semantics = [#tpu.dimension_semantics<parallel>], iteration_bounds = array<i64: 1>, scalar_prefetch = 0 : i64, scratch_operands = 0 : i64, tpu.core_type = #tpu.core_type<tc>, window_params = [{transform_indices = @transform_0, window_bounds = array<i64: 8, 256>}, {pipeline_mode = #tpu.pipeline_mode<synchronous>, transform_indices = @transform_1, window_bounds = array<i64: 2, 8>}, {pipeline_mode = #tpu.pipeline_mode<synchronous>, transform_indices = @transform_2, window_bounds = array<i64: 16, 8>}, {pipeline_mode = #tpu.pipeline_mode<synchronous>, transform_indices = @transform_3, window_bounds = array<i64: 16, 16>}, {pipeline_mode = #tpu.pipeline_mode<synchronous>, transform_indices = @transform_4, window_bounds = array<i64: 6, 16>}, {pipeline_mode = #tpu.pipeline_mode<synchronous>, transform_indices = @transform_5, window_bounds = array<i64: 3, 1>}, {pipeline_mode = #tpu.pipeline_mode<synchronous>, transform_indices = @transform_6, window_bounds = array<i64: 3, 1>}, {pipeline_mode = #tpu.pipeline_mode<synchronous>, transform_indices = @transform_7, window_bounds = array<i64: 2, 256>}, {transform_indices = @transform_8, window_bounds = array<i64: 8, 256>}]} {
    %c0 = arith.constant 0 : index
    %c0_0 = arith.constant 0 : index
    %0 = vector.load %arg1[%c0, %c0_0] : memref<8x256xf32, #tpu.memory_space<vmem>>, vector<8x256xf32>
    %c0_1 = arith.constant 0 : index
    %c0_2 = arith.constant 0 : index
    %1 = vector.load %arg2[%c0_1, %c0_2] : memref<2x8xf32, #tpu.memory_space<vmem>>, vector<2x8xf32>
    %cst = arith.constant dense<0.000000e+00> : vector<2x256xf32>
    %2 = tpu.matmul %1, %0, %cst {dimension_numbers = #tpu.dot_dimension_numbers<[1], [0], [0], [1], [0, 0, 1, 1], [], []>} : vector<2x8xf32>, vector<8x256xf32>, vector<2x256xf32> -> vector<2x256xf32>
    %c0_3 = arith.constant 0 : index
    %c0_4 = arith.constant 0 : index
    %3 = vector.load %arg8[%c0_3, %c0_4] : memref<2x256xf32, #tpu.memory_space<vmem>>, vector<1x256xf32>
    %c1 = arith.constant 1 : index
    %c0_5 = arith.constant 0 : index
    %4 = vector.load %arg8[%c1, %c0_5] : memref<2x256xf32, #tpu.memory_space<vmem>>, vector<1x256xf32>
    %c1_i32 = arith.constant 1 : i32
    %5 = tpu.dynamic_rotate %3 by %c1_i32 dim 1 : vector<1x256xf32>, i32 -> vector<1x256xf32>
    %c1_i32_6 = arith.constant 1 : i32
    %6 = tpu.dynamic_rotate %4 by %c1_i32_6 dim 1 : vector<1x256xf32>, i32 -> vector<1x256xf32>
    %7 = arith.subf %5, %3 : vector<1x256xf32>
    %8 = math.absf %7 : vector<1x256xf32>
    %9 = arith.subf %6, %4 : vector<1x256xf32>
    %10 = math.absf %9 : vector<1x256xf32>
    %11 = arith.addf %8, %10 : vector<1x256xf32>
    %cst_7 = arith.constant 1.000000e+00 : f32
    %12 = vector.broadcast %cst_7 : f32 to vector<1x256xf32>
    %13 = arith.cmpf oeq, %11, %12 : vector<1x256xf32>
    %cst_8 = arith.constant 1.000000e+00 : f32
    %cst_9 = arith.constant 0.000000e+00 : f32
    %14 = vector.broadcast %cst_8 : f32 to vector<1x256xf32>
    %15 = vector.broadcast %cst_9 : f32 to vector<1x256xf32>
    %16 = arith.select %13, %14, %15 : vector<1x256xi1>, vector<1x256xf32>
    %c255_i32 = arith.constant 255 : i32
    %17 = tpu.dynamic_rotate %3 by %c255_i32 dim 1 : vector<1x256xf32>, i32 -> vector<1x256xf32>
    %c255_i32_10 = arith.constant 255 : i32
    %18 = tpu.dynamic_rotate %4 by %c255_i32_10 dim 1 : vector<1x256xf32>, i32 -> vector<1x256xf32>
    %19 = arith.subf %17, %3 : vector<1x256xf32>
    %20 = math.absf %19 : vector<1x256xf32>
    %21 = arith.subf %18, %4 : vector<1x256xf32>
    %22 = math.absf %21 : vector<1x256xf32>
    %23 = arith.addf %20, %22 : vector<1x256xf32>
    %cst_11 = arith.constant 1.000000e+00 : f32
    %24 = vector.broadcast %cst_11 : f32 to vector<1x256xf32>
    %25 = arith.cmpf oeq, %23, %24 : vector<1x256xf32>
    %cst_12 = arith.constant 1.000000e+00 : f32
    %cst_13 = arith.constant 0.000000e+00 : f32
    %26 = vector.broadcast %cst_12 : f32 to vector<1x256xf32>
    %27 = vector.broadcast %cst_13 : f32 to vector<1x256xf32>
    %28 = arith.select %25, %26, %27 : vector<1x256xi1>, vector<1x256xf32>
    %c16_i32 = arith.constant 16 : i32
    %29 = tpu.dynamic_rotate %3 by %c16_i32 dim 1 : vector<1x256xf32>, i32 -> vector<1x256xf32>
    %c16_i32_14 = arith.constant 16 : i32
    %30 = tpu.dynamic_rotate %4 by %c16_i32_14 dim 1 : vector<1x256xf32>, i32 -> vector<1x256xf32>
    %31 = arith.subf %29, %3 : vector<1x256xf32>
    %32 = math.absf %31 : vector<1x256xf32>
    %33 = arith.subf %30, %4 : vector<1x256xf32>
    %34 = math.absf %33 : vector<1x256xf32>
    %35 = arith.addf %32, %34 : vector<1x256xf32>
    %cst_15 = arith.constant 1.000000e+00 : f32
    %36 = vector.broadcast %cst_15 : f32 to vector<1x256xf32>
    %37 = arith.cmpf oeq, %35, %36 : vector<1x256xf32>
    %cst_16 = arith.constant 1.000000e+00 : f32
    %cst_17 = arith.constant 0.000000e+00 : f32
    %38 = vector.broadcast %cst_16 : f32 to vector<1x256xf32>
    %39 = vector.broadcast %cst_17 : f32 to vector<1x256xf32>
    %40 = arith.select %37, %38, %39 : vector<1x256xi1>, vector<1x256xf32>
    %c240_i32 = arith.constant 240 : i32
    %41 = tpu.dynamic_rotate %3 by %c240_i32 dim 1 : vector<1x256xf32>, i32 -> vector<1x256xf32>
    %c240_i32_18 = arith.constant 240 : i32
    %42 = tpu.dynamic_rotate %4 by %c240_i32_18 dim 1 : vector<1x256xf32>, i32 -> vector<1x256xf32>
    %43 = arith.subf %41, %3 : vector<1x256xf32>
    %44 = math.absf %43 : vector<1x256xf32>
    %45 = arith.subf %42, %4 : vector<1x256xf32>
    %46 = math.absf %45 : vector<1x256xf32>
    %47 = arith.addf %44, %46 : vector<1x256xf32>
    %cst_19 = arith.constant 1.000000e+00 : f32
    %48 = vector.broadcast %cst_19 : f32 to vector<1x256xf32>
    %49 = arith.cmpf oeq, %47, %48 : vector<1x256xf32>
    %cst_20 = arith.constant 1.000000e+00 : f32
    %cst_21 = arith.constant 0.000000e+00 : f32
    %50 = vector.broadcast %cst_20 : f32 to vector<1x256xf32>
    %51 = vector.broadcast %cst_21 : f32 to vector<1x256xf32>
    %52 = arith.select %49, %50, %51 : vector<1x256xi1>, vector<1x256xf32>
    %cst_22 = arith.constant -4.000000e+00 : f32
    %53 = vector.broadcast %cst_22 : f32 to vector<2x256xf32>
    %54 = arith.mulf %53, %2 : vector<2x256xf32>
    %c1_i32_23 = arith.constant 1 : i32
    %55 = tpu.dynamic_rotate %2 by %c1_i32_23 dim 1 : vector<2x256xf32>, i32 -> vector<2x256xf32>
    %56 = vector.broadcast %16 : vector<1x256xf32> to vector<2x256xf32>
    %57 = arith.mulf %55, %56 : vector<2x256xf32>
    %58 = arith.addf %54, %57 : vector<2x256xf32>
    %c255_i32_24 = arith.constant 255 : i32
    %59 = tpu.dynamic_rotate %2 by %c255_i32_24 dim 1 : vector<2x256xf32>, i32 -> vector<2x256xf32>
    %60 = vector.broadcast %28 : vector<1x256xf32> to vector<2x256xf32>
    %61 = arith.mulf %59, %60 : vector<2x256xf32>
    %62 = arith.addf %58, %61 : vector<2x256xf32>
    %c16_i32_25 = arith.constant 16 : i32
    %63 = tpu.dynamic_rotate %2 by %c16_i32_25 dim 1 : vector<2x256xf32>, i32 -> vector<2x256xf32>
    %64 = vector.broadcast %40 : vector<1x256xf32> to vector<2x256xf32>
    %65 = arith.mulf %63, %64 : vector<2x256xf32>
    %66 = arith.addf %62, %65 : vector<2x256xf32>
    %c240_i32_26 = arith.constant 240 : i32
    %67 = tpu.dynamic_rotate %2 by %c240_i32_26 dim 1 : vector<2x256xf32>, i32 -> vector<2x256xf32>
    %68 = vector.broadcast %52 : vector<1x256xf32> to vector<2x256xf32>
    %69 = arith.mulf %67, %68 : vector<2x256xf32>
    %70 = arith.addf %66, %69 : vector<2x256xf32>
    %cst_27 = arith.constant -4.000000e+00 : f32
    %71 = vector.broadcast %cst_27 : f32 to vector<2x256xf32>
    %72 = arith.mulf %71, %70 : vector<2x256xf32>
    %c1_i32_28 = arith.constant 1 : i32
    %73 = tpu.dynamic_rotate %70 by %c1_i32_28 dim 1 : vector<2x256xf32>, i32 -> vector<2x256xf32>
    %74 = vector.broadcast %16 : vector<1x256xf32> to vector<2x256xf32>
    %75 = arith.mulf %73, %74 : vector<2x256xf32>
    %76 = arith.addf %72, %75 : vector<2x256xf32>
    %c255_i32_29 = arith.constant 255 : i32
    %77 = tpu.dynamic_rotate %70 by %c255_i32_29 dim 1 : vector<2x256xf32>, i32 -> vector<2x256xf32>
    %78 = vector.broadcast %28 : vector<1x256xf32> to vector<2x256xf32>
    %79 = arith.mulf %77, %78 : vector<2x256xf32>
    %80 = arith.addf %76, %79 : vector<2x256xf32>
    %c16_i32_30 = arith.constant 16 : i32
    %81 = tpu.dynamic_rotate %70 by %c16_i32_30 dim 1 : vector<2x256xf32>, i32 -> vector<2x256xf32>
    %82 = vector.broadcast %40 : vector<1x256xf32> to vector<2x256xf32>
    %83 = arith.mulf %81, %82 : vector<2x256xf32>
    %84 = arith.addf %80, %83 : vector<2x256xf32>
    %c240_i32_31 = arith.constant 240 : i32
    %85 = tpu.dynamic_rotate %70 by %c240_i32_31 dim 1 : vector<2x256xf32>, i32 -> vector<2x256xf32>
    %86 = vector.broadcast %52 : vector<1x256xf32> to vector<2x256xf32>
    %87 = arith.mulf %85, %86 : vector<2x256xf32>
    %88 = arith.addf %84, %87 : vector<2x256xf32>
    %cst_32 = arith.constant dense<0.000000e+00> : vector<8xf32>
    %89 = vector.multi_reduction <add>, %0, %cst_32 [1] : vector<8x256xf32> to vector<8xf32>
    %90 = vector.shape_cast %89 : vector<8xf32> to vector<8x1xf32>
    %cst_33 = arith.constant 3.906250e-03 : f32
    %91 = vector.broadcast %cst_33 : f32 to vector<8x1xf32>
    %92 = arith.mulf %90, %91 : vector<8x1xf32>
    %c0_34 = arith.constant 0 : index
    %c0_35 = arith.constant 0 : index
    %93 = vector.load %arg3[%c0_34, %c0_35] : memref<16x8xf32, #tpu.memory_space<vmem>>, vector<16x8xf32>
    %cst_36 = arith.constant dense<0.000000e+00> : vector<16x1xf32>
    %94 = tpu.matmul %93, %92, %cst_36 {dimension_numbers = #tpu.dot_dimension_numbers<[1], [0], [0], [1], [0, 0, 1, 1], [], []>} : vector<16x8xf32>, vector<8x1xf32>, vector<16x1xf32> -> vector<16x1xf32>
    %c0_37 = arith.constant 0 : index
    %c0_38 = arith.constant 0 : index
    %95 = vector.load %arg4[%c0_37, %c0_38] : memref<16x16xf32, #tpu.memory_space<vmem>>, vector<16x16xf32>
    %cst_39 = arith.constant dense<0.000000e+00> : vector<16x1xf32>
    %96 = tpu.matmul %95, %94, %cst_39 {dimension_numbers = #tpu.dot_dimension_numbers<[1], [0], [0], [1], [0, 0, 1, 1], [], []>} : vector<16x16xf32>, vector<16x1xf32>, vector<16x1xf32> -> vector<16x1xf32>
    %cst_40 = arith.constant 0.000000e+00 : f32
    %97 = vector.broadcast %cst_40 : f32 to vector<16x1xf32>
    %98 = arith.maximumf %96, %97 : vector<16x1xf32>
    %c0_41 = arith.constant 0 : index
    %c0_42 = arith.constant 0 : index
    %99 = vector.load %arg5[%c0_41, %c0_42] : memref<6x16xf32, #tpu.memory_space<vmem>>, vector<6x16xf32>
    %cst_43 = arith.constant dense<0.000000e+00> : vector<6x1xf32>
    %100 = tpu.matmul %99, %98, %cst_43 {dimension_numbers = #tpu.dot_dimension_numbers<[1], [0], [0], [1], [0, 0, 1, 1], [], []>} : vector<6x16xf32>, vector<16x1xf32>, vector<6x1xf32> -> vector<6x1xf32>
    %c0_44 = arith.constant 0 : index
    %c0_45 = arith.constant 0 : index
    %101 = vector.load %arg6[%c0_44, %c0_45] : memref<3x1xf32, #tpu.memory_space<vmem>>, vector<3x1xf32>
    %c0_46 = arith.constant 0 : index
    %c0_47 = arith.constant 0 : index
    %102 = vector.load %arg7[%c0_46, %c0_47] : memref<3x1xf32, #tpu.memory_space<vmem>>, vector<3x1xf32>
    %103 = vector.extract_strided_slice %100 {offsets = [0, 0], sizes = [3, 1], strides = [1, 1]} : vector<6x1xf32> to vector<3x1xf32>
    %cst_48 = arith.constant dense<0xFF800000> : vector<1xf32>
    %104 = vector.multi_reduction <maximumf>, %103, %cst_48 [0] : vector<3x1xf32> to vector<1xf32>
    %105 = vector.shape_cast %104 : vector<1xf32> to vector<1x1xf32>
    %106 = vector.broadcast %105 : vector<1x1xf32> to vector<3x1xf32>
    %107 = arith.subf %103, %106 : vector<3x1xf32>
    %108 = math.exp %107 : vector<3x1xf32>
    %cst_49 = arith.constant dense<0.000000e+00> : vector<1xf32>
    %109 = vector.multi_reduction <add>, %108, %cst_49 [0] : vector<3x1xf32> to vector<1xf32>
    %110 = vector.shape_cast %109 : vector<1xf32> to vector<1x1xf32>
    %111 = tpu.reciprocal %110 {approx = true} : vector<1x1xf32> -> vector<1x1xf32>
    %112 = vector.broadcast %111 : vector<1x1xf32> to vector<3x1xf32>
    %113 = arith.mulf %108, %112 : vector<3x1xf32>
    %114 = arith.mulf %101, %113 : vector<3x1xf32>
    %cst_50 = arith.constant dense<0.000000e+00> : vector<1xf32>
    %115 = vector.multi_reduction <add>, %114, %cst_50 [0] : vector<3x1xf32> to vector<1xf32>
    %116 = vector.shape_cast %115 : vector<1xf32> to vector<1x1xf32>
    %117 = arith.mulf %102, %113 : vector<3x1xf32>
    %cst_51 = arith.constant dense<0.000000e+00> : vector<1xf32>
    %118 = vector.multi_reduction <add>, %117, %cst_51 [0] : vector<3x1xf32> to vector<1xf32>
    %119 = vector.shape_cast %118 : vector<1xf32> to vector<1x1xf32>
    %120 = vector.extract_strided_slice %70 {offsets = [0, 0], sizes = [1, 256], strides = [1, 1]} : vector<2x256xf32> to vector<1x256xf32>
    %121 = vector.broadcast %116 : vector<1x1xf32> to vector<1x256xf32>
    %122 = arith.mulf %121, %120 : vector<1x256xf32>
    %123 = vector.extract_strided_slice %88 {offsets = [0, 0], sizes = [1, 256], strides = [1, 1]} : vector<2x256xf32> to vector<1x256xf32>
    %124 = vector.broadcast %119 : vector<1x1xf32> to vector<1x256xf32>
    %125 = arith.mulf %124, %123 : vector<1x256xf32>
    %126 = arith.addf %122, %125 : vector<1x256xf32>
    %cst_52 = arith.constant 0.000000e+00 : f32
    %127 = vector.broadcast %cst_52 : f32 to vector<1x256xf32>
    %128 = arith.subf %127, %126 : vector<1x256xf32>
    %129 = math.exp %128 : vector<1x256xf32>
    %cst_53 = arith.constant 1.000000e+00 : f32
    %130 = vector.broadcast %cst_53 : f32 to vector<1x256xf32>
    %131 = arith.addf %130, %129 : vector<1x256xf32>
    %132 = tpu.reciprocal %131 {approx = true} : vector<1x256xf32> -> vector<1x256xf32>
    %cst_54 = arith.constant 1.000000e+00 : f32
    %133 = vector.broadcast %cst_54 : f32 to vector<1x256xf32>
    %134 = arith.addf %133, %132 : vector<1x256xf32>
    %135 = vector.extract_strided_slice %0 {offsets = [0, 0], sizes = [4, 256], strides = [1, 1]} : vector<8x256xf32> to vector<4x256xf32>
    %136 = vector.broadcast %134 : vector<1x256xf32> to vector<4x256xf32>
    %137 = arith.mulf %135, %136 : vector<4x256xf32>
    %c0_55 = arith.constant 0 : index
    %c0_56 = arith.constant 0 : index
    %138 = vector.load %arg9[%c0_55, %c0_56] : memref<8x256xf32, #tpu.memory_space<vmem>>, vector<4x256xf32>
    tpu.vector_store %arg9[%c0_55, %c0_56], %137 {strides = array<i32>} : memref<8x256xf32, #tpu.memory_space<vmem>>, vector<4x256xf32>,
    %139 = vector.extract_strided_slice %100 {offsets = [3, 0], sizes = [3, 1], strides = [1, 1]} : vector<6x1xf32> to vector<3x1xf32>
    %cst_57 = arith.constant dense<0xFF800000> : vector<1xf32>
    %140 = vector.multi_reduction <maximumf>, %139, %cst_57 [0] : vector<3x1xf32> to vector<1xf32>
    %141 = vector.shape_cast %140 : vector<1xf32> to vector<1x1xf32>
    %142 = vector.broadcast %141 : vector<1x1xf32> to vector<3x1xf32>
    %143 = arith.subf %139, %142 : vector<3x1xf32>
    %144 = math.exp %143 : vector<3x1xf32>
    %cst_58 = arith.constant dense<0.000000e+00> : vector<1xf32>
    %145 = vector.multi_reduction <add>, %144, %cst_58 [0] : vector<3x1xf32> to vector<1xf32>
    %146 = vector.shape_cast %145 : vector<1xf32> to vector<1x1xf32>
    %147 = tpu.reciprocal %146 {approx = true} : vector<1x1xf32> -> vector<1x1xf32>
    %148 = vector.broadcast %147 : vector<1x1xf32> to vector<3x1xf32>
    %149 = arith.mulf %144, %148 : vector<3x1xf32>
    %150 = arith.mulf %101, %149 : vector<3x1xf32>
    %cst_59 = arith.constant dense<0.000000e+00> : vector<1xf32>
    %151 = vector.multi_reduction <add>, %150, %cst_59 [0] : vector<3x1xf32> to vector<1xf32>
    %152 = vector.shape_cast %151 : vector<1xf32> to vector<1x1xf32>
    %153 = arith.mulf %102, %149 : vector<3x1xf32>
    %cst_60 = arith.constant dense<0.000000e+00> : vector<1xf32>
    %154 = vector.multi_reduction <add>, %153, %cst_60 [0] : vector<3x1xf32> to vector<1xf32>
    %155 = vector.shape_cast %154 : vector<1xf32> to vector<1x1xf32>
    %156 = vector.extract_strided_slice %70 {offsets = [1, 0], sizes = [1, 256], strides = [1, 1]} : vector<2x256xf32> to vector<1x256xf32>
    %157 = vector.broadcast %152 : vector<1x1xf32> to vector<1x256xf32>
    %158 = arith.mulf %157, %156 : vector<1x256xf32>
    %159 = vector.extract_strided_slice %88 {offsets = [1, 0], sizes = [1, 256], strides = [1, 1]} : vector<2x256xf32> to vector<1x256xf32>
    %160 = vector.broadcast %155 : vector<1x1xf32> to vector<1x256xf32>
    %161 = arith.mulf %160, %159 : vector<1x256xf32>
    %162 = arith.addf %158, %161 : vector<1x256xf32>
    %cst_61 = arith.constant 0.000000e+00 : f32
    %163 = vector.broadcast %cst_61 : f32 to vector<1x256xf32>
    %164 = arith.subf %163, %162 : vector<1x256xf32>
    %165 = math.exp %164 : vector<1x256xf32>
    %cst_62 = arith.constant 1.000000e+00 : f32
    %166 = vector.broadcast %cst_62 : f32 to vector<1x256xf32>
    %167 = arith.addf %166, %165 : vector<1x256xf32>
    %168 = tpu.reciprocal %167 {approx = true} : vector<1x256xf32> -> vector<1x256xf32>
    %cst_63 = arith.constant 1.000000e+00 : f32
    %169 = vector.broadcast %cst_63 : f32 to vector<1x256xf32>
    %170 = arith.addf %169, %168 : vector<1x256xf32>
    %171 = vector.extract_strided_slice %0 {offsets = [4, 0], sizes = [4, 256], strides = [1, 1]} : vector<8x256xf32> to vector<4x256xf32>
    %172 = vector.broadcast %170 : vector<1x256xf32> to vector<4x256xf32>
    %173 = arith.mulf %171, %172 : vector<4x256xf32>
    %c4 = arith.constant 4 : index
    %c0_64 = arith.constant 0 : index
    %174 = vector.load %arg9[%c4, %c0_64] : memref<8x256xf32, #tpu.memory_space<vmem>>, vector<4x256xf32>
    tpu.vector_store %arg9[%c4, %c0_64], %173 {strides = array<i32>} : memref<8x256xf32, #tpu.memory_space<vmem>>, vector<4x256xf32>,
    return
  }
  func.func @transform_0(%arg0: i32) -> (i32, i32) {
    %c0_i32 = arith.constant 0 : i32
    %c0_i32_0 = arith.constant 0 : i32
    return %arg0, %c0_i32 : i32, i32
  }
  func.func @transform_1(%arg0: i32) -> (i32, i32) {
    %c0_i32 = arith.constant 0 : i32
    %c0_i32_0 = arith.constant 0 : i32
    %c0_i32_1 = arith.constant 0 : i32
    return %c0_i32, %c0_i32_0 : i32, i32
  }
  func.func @transform_2(%arg0: i32) -> (i32, i32) {
    %c0_i32 = arith.constant 0 : i32
    %c0_i32_0 = arith.constant 0 : i32
    %c0_i32_1 = arith.constant 0 : i32
    return %c0_i32, %c0_i32_0 : i32, i32
  }
  func.func @transform_3(%arg0: i32) -> (i32, i32) {
    %c0_i32 = arith.constant 0 : i32
    %c0_i32_0 = arith.constant 0 : i32
    %c0_i32_1 = arith.constant 0 : i32
    return %c0_i32, %c0_i32_0 : i32, i32
  }
  func.func @transform_4(%arg0: i32) -> (i32, i32) {
    %c0_i32 = arith.constant 0 : i32
    %c0_i32_0 = arith.constant 0 : i32
    %c0_i32_1 = arith.constant 0 : i32
    return %c0_i32, %c0_i32_0 : i32, i32
  }
  func.func @transform_5(%arg0: i32) -> (i32, i32) {
    %c0_i32 = arith.constant 0 : i32
    %c0_i32_0 = arith.constant 0 : i32
    %c0_i32_1 = arith.constant 0 : i32
    return %c0_i32, %c0_i32_0 : i32, i32
  }
  func.func @transform_6(%arg0: i32) -> (i32, i32) {
    %c0_i32 = arith.constant 0 : i32
    %c0_i32_0 = arith.constant 0 : i32
    %c0_i32_1 = arith.constant 0 : i32
    return %c0_i32, %c0_i32_0 : i32, i32
  }
  func.func @transform_7(%arg0: i32) -> (i32, i32) {
    %c0_i32 = arith.constant 0 : i32
    %c0_i32_0 = arith.constant 0 : i32
    %c0_i32_1 = arith.constant 0 : i32
    return %c0_i32, %c0_i32_0 : i32, i32
  }
  func.func @transform_8(%arg0: i32) -> (i32, i32) {
    %c0_i32 = arith.constant 0 : i32
    %c0_i32_0 = arith.constant 0 : i32
    return %arg0, %c0_i32 : i32, i32
  }
}

</mosaic_0001>

<bundles_post_ra>
// kernel: tpu_custom_call.1
= control target key start
LH: loop header
LB: loop body
LE: loop exit
PB: predicated region body
PF: predicated region fallthrough
CT: control target
= control target key end

     0   :  { %13 = vsyncpa [#allocation3], 0  ;;  %s1055_s0 = inlined_call_operand.vmem [shape: f32[8,256], index: 0, kind: input, shape index: {}]   ;;  %s1056_s1 = inlined_call_operand.hbm [shape: f32[2,8], index: 1, kind: input, shape index: {}]   ;;  %s1057_s2 = inlined_call_operand.vmem [shape: f32[16,8], index: 2, kind: input, shape index: {}]   ;;  %s1058_s3 = inlined_call_operand.hbm [shape: f32[16,16], index: 3, kind: input, shape index: {}]   ;;  %s1059_s4 = inlined_call_operand.vmem [shape: f32[6,16], index: 4, kind: input, shape index: {}]   ;;  %s1060_s5 = inlined_call_operand.vmem [shape: f32[3,1], index: 5, kind: input, shape index: {}]   ;;  %s1061_s6 = inlined_call_operand.vmem [shape: f32[3,1], index: 6, kind: input, shape index: {}]   ;;  %s1062_s7 = inlined_call_operand.vmem [shape: f32[2,256], index: 7, kind: input, shape index: {}]   ;;  %s1063_s8 = inlined_call_operand.hbm [shape: f32[8,256], index: 8, kind: output, shape index: {}]  }
   0x1   :  { %14 = vsyncpa [#allocation6], 0 }
   0x2   :  { %15 = vsyncpa [#allocation4], 0  ;;  %s23_s29 = sshll.u32 %s1056_s1, 4  ;;  %s707_s30 = smov [#allocation2]   ;;  %s24_s29 = int_to_ptr.hbm [resolvable:$true] %s23_s29 }
   0x3   :  { %s25_s9 = sshll.u32 %s707_s30, 4  ;;  %s35_s12 = sshll.u32 %s1058_s3, 4  ;;  %s26_s9 = int_to_ptr.vmem [resolvable:$true] %s25_s9  ;;  %s36_s12 = int_to_ptr.hbm [resolvable:$true] %s35_s12 }
   0x4   :  { %28 = dma.hbm_to_vmem [thread:$0]  %s24_s29, 32, %s26_s9, [#allocation3]  }
   0x5   :  { %s708_s13 = smov [#allocation5]   ;;  %s709_s15 = smov 128  }
   0x6   :  { %s37_s14 = sshll.u32 %s708_s13, 4  ;;  %s710_s16 = smov 8   ;;  %s38_s14 = int_to_ptr.vmem [resolvable:$true] %s37_s14 }
   0x7   :  { %43 = dma.hbm_to_vmem [thread:$0]  %s36_s12, 256, %s38_s14, [#allocation6], %s709_s15, %s709_s15, %s710_s16  }
   0x8   :  { %701 = dma.done.wait [#allocation3], 32  }
   0x9   :  { %702 = vsyncadd [#allocation3], 4294967264 }
   0xa   :  { %703 = dma.done.wait [#allocation6], 256  }
   0xb   :  { %704 = vsyncadd [#allocation6], 4294967040  ;;  %vm63_vm0 = vcmask 64512   ;;  %v772_v0 = vld [vmem:[%s1055_s0] sm:$0xff]  ;;  %v777_v1 = vld [vmem:[%s1055_s0 + $0x8] sm:$0xff]  ;;  %s711_s0 = smov 1   ;;  %v119_v24 = vlaneseq }
   0xc   :  { %v62_v2 = vld [vmem:[#allocation2] sm:$0x3]  ;;  %v322_v3 = vadd.f32 %v777_v1, %v772_v0  ;;  %82 = vmatpush.msra.mxu0 %v772_v0  ;;  %102 = vmatpush.msra.mxu1 %v777_v1  ;;  %s713_s23 = smov 16   ;;  %s714_s24 = smov 112   ;;  %v327_v13 = vld [vmem:[%s1057_s2 + $0x8] sm:$0xff]  ;;  %vm359_vm13 = vcmask 130048  }
   0xd   :  { %v107_v4 = vld [vmem:[%s1062_s7] ss:$2 sm:$0x3]  ;;  %v583_v5 = vld [vmem:[%s1062_s7 + $0x1] ss:$2 sm:$0x3]  ;;  %581 = vmatmul.msk.f32.vlgmr.msra.gmra.mxu0 %vm63_vm0, %v62_v2  ;;  %582 = vmatmul.msk.f32.vlgmr.msra.gmra.mxu1 %vm63_vm0, %v62_v2 }
   0xe   :  { %v791_v6 = vperm.slane %v107_v4, 1  ;;  %v793_v7 = vperm.slane %v583_v5, 1  ;;  %323 = vadd.xlane.f32.xlu0 %v322_v3  ;;  %v799_v8 = vperm.slane %v583_v5, 0  ;;  %v801_v9 = vperm.slane %v107_v4, 0  ;;  %s712_s7 = smov 127   ;;  %v326_v12 = vld [vmem:[%s1057_s2] sm:$0xff] }
   0xf   :  { %v859_v25 = vand.u32 127, %v119_v24  ;;  %vm417_vm14 = vcmask 2048   ;;  %vm487_vm15 = vcmask 5123   ;;  %s570_s13 = sshll.u32 %s1063_s8, 4  ;;  %s571_s13 = int_to_ptr.hbm [resolvable:$true] %s570_s13 }
  0x10   :  { %117 = vrot.lane.b32.xlu1 %v791_v6, %s711_s0  ;;  %131 = vrot.lane.b32.xlu2 %v793_v7, %s711_s0 }
  0x11   :  { %vm121_vm1 = vcmp.lt.s32.totalorder %v859_v25, 1  ;;  %vm153_vm2 = vcmp.lt.s32.totalorder %v859_v25, 127  ;;  %vm180_vm3 = vcmp.lt.s32.totalorder %v859_v25, 16  ;;  %vm207_vm4 = vcmp.lt.s32.totalorder %v859_v25, 112 }
  0x18   :  { %129 = vrot.lane.b32.xlu1 %v799_v8, %s711_s0  ;;  %149 = vrot.lane.b32.xlu2 %v801_v9, %s712_s7 }
  0x20   :  { %151 = vrot.lane.b32.xlu1 %v791_v6, %s712_s7  ;;  %156 = vrot.lane.b32.xlu2 %v799_v8, %s712_s7 }
  0x22   :  { %115 = vrot.lane.b32.xlu0 %v801_v9, %s711_s0 }
  0x28   :  { %158 = vrot.lane.b32.xlu1 %v793_v7, %s712_s7  ;;  %176 = vrot.lane.b32.xlu2 %v801_v9, %s713_s23 }
  0x2a   :  { %178 = vrot.lane.b32.xlu0 %v791_v6, %s713_s23 }
  0x30   :  { %183 = vrot.lane.b32.xlu1 %v799_v8, %s713_s23  ;;  %185 = vrot.lane.b32.xlu2 %v793_v7, %s713_s23 }
  0x32   :  { %203 = vrot.lane.b32.xlu0 %v801_v9, %s714_s24 }
  0x38   :  { %205 = vrot.lane.b32.xlu1 %v791_v6, %s714_s24  ;;  %210 = vrot.lane.b32.xlu2 %v799_v8, %s714_s24 }
  0x3a   :  { %212 = vrot.lane.b32.xlu0 %v793_v7, %s714_s24 }
  0x6a   :  { %v132_v16 = vpop.permute.xlu2 %131 }
  0x72   :  { %v150_v18 = vpop.permute.xlu2 %149 }
  0x7a   :  { %v157_v20 = vpop.permute.xlu2 %156 }
  0x81   :  { %v324_v10 = vpop.xlane.xlu0 %323 }
  0x82   :  { %v325_v11 = vmul.f32 0.00390625, %v324_v10  ;;  %v118_v17 = vpop.permute.xlu1 %117  ;;  %v177_v23 = vpop.permute.xlu2 %176 }
  0x84   :  { %349 = vmatpush.msra.mxu2 %v325_v11 }
  0x85   :  { %584 = vmatmul.msk.f32.vlgmr.msra.gmra.mxu2 %vm63_vm0, %v326_v12 }
  0x8a   :  { %v838_v14 = vpop.f32.mrf.mxu0  ;;  %v844_v15 = vpop.f32.mrf.mxu1 }
  0x8b   :  { %232 = vrot.lane.b32.xlu1 %v838_v14, %s711_s0  ;;  %244 = vrot.lane.b32.xlu0 %v838_v14, %s712_s7  ;;  %v130_v19 = vpop.permute.xlu1 %129  ;;  %v186_v28 = vpop.permute.xlu2 %185 }
  0x8c   :  { %234 = vrot.lane.b32.xlu2 %v844_v15, %s711_s0  ;;  %v134_v29 = vsel %vm121_vm1, %v132_v16, %v130_v19  ;;  %v133_v30 = vsel %vm121_vm1, %v130_v19, %v132_v16 }
  0x8d   :  { %585 = vmatmul.msk.f32.gmra.mxu2 %vm63_vm0, %v327_v13  ;;  %v139_v33 = vsub.f32 %v134_v29, %v799_v8  ;;  %v140_v36 = vsub.f32 %v133_v30, %v793_v7 }
  0x8f   :  { %v141_v40 = vand.u32 2147483647, %v139_v33  ;;  %v142_v44 = vand.u32 2147483647, %v140_v36 }
  0x93   :  { %246 = vrot.lane.b32.xlu1 %v844_v15, %s712_s7  ;;  %258 = vrot.lane.b32.xlu0 %v844_v15, %s713_s23  ;;  %v152_v21 = vpop.permute.xlu1 %151  ;;  %v211_v43 = vpop.permute.xlu2 %210 }
  0x94   :  { %256 = vrot.lane.b32.xlu2 %v838_v14, %s713_s23  ;;  %v116_v22 = vpop.permute.xlu0 %115  ;;  %v154_v39 = vsel %vm153_vm2, %v150_v18, %v152_v21  ;;  %v155_v41 = vsel %vm153_vm2, %v152_v21, %v150_v18 }
  0x95   :  { %v122_v31 = vsel %vm121_vm1, %v116_v22, %v118_v17  ;;  %v123_v32 = vsel %vm121_vm1, %v118_v17, %v116_v22  ;;  %v162_v48 = vsub.f32 %v154_v39, %v801_v9  ;;  %v163_v51 = vsub.f32 %v155_v41, %v791_v6 }
  0x96   :  { %v135_v37 = vsub.f32 %v123_v32, %v801_v9  ;;  %v136_v38 = vsub.f32 %v122_v31, %v791_v6 }
  0x97   :  { %v164_v2 = vand.u32 2147483647, %v162_v48  ;;  %v165_v3 = vand.u32 2147483647, %v163_v51 }
  0x98   :  { %v137_v45 = vand.u32 2147483647, %v135_v37  ;;  %v138_v46 = vand.u32 2147483647, %v136_v38 }
  0x9a   :  { %v143_v56 = vadd.f32 %v141_v40, %v137_v45  ;;  %v144_v57 = vadd.f32 %v142_v44, %v138_v46  ;;  %v230_v44 = vmul.f32 -4.0, %v838_v14 }
  0x9b   :  { %268 = vrot.lane.b32.xlu1 %v838_v14, %s714_s24  ;;  %v159_v26 = vpop.permute.xlu1 %158 }
  0x9c   :  { %270 = vrot.lane.b32.xlu2 %v844_v15, %s714_s24  ;;  %v179_v27 = vpop.permute.xlu0 %178  ;;  %v160_v42 = vsel %vm153_vm2, %v157_v20, %v159_v26  ;;  %v161_v47 = vsel %vm153_vm2, %v159_v26, %v157_v20  ;;  %vm145_vm5 = vcmp.eq.f32.partialorder %v143_v56, 1.0  ;;  %vm146_vm6 = vcmp.eq.f32.partialorder %v144_v57, 1.0 }
  0x9d   :  { %v181_v49 = vsel %vm180_vm3, %v177_v23, %v179_v27  ;;  %v182_v50 = vsel %vm180_vm3, %v179_v27, %v177_v23  ;;  %v166_v52 = vsub.f32 %v160_v42, %v799_v8  ;;  %v167_v55 = vsub.f32 %v161_v47, %v793_v7 }
  0x9e   :  { %v189_v58 = vsub.f32 %v182_v50, %v801_v9  ;;  %v190_v59 = vsub.f32 %v181_v49, %v791_v6 }
  0x9f   :  { %v168_v4 = vand.u32 2147483647, %v166_v52  ;;  %v169_v10 = vand.u32 2147483647, %v167_v55 }
  0xa0   :  { %v191_v16 = vand.u32 2147483647, %v189_v58  ;;  %v192_v17 = vand.u32 2147483647, %v190_v59 }
  0xa1   :  { %v170_v26 = vadd.f32 %v168_v4, %v164_v2  ;;  %v171_v27 = vadd.f32 %v169_v10, %v165_v3 }
  0xa3   :  { %v184_v34 = vpop.permute.xlu1 %183  ;;  %vm172_vm7 = vcmp.eq.f32.partialorder %v170_v26, 1.0  ;;  %vm173_vm8 = vcmp.eq.f32.partialorder %v171_v27, 1.0 }
  0xa4   :  { %v204_v35 = vpop.permute.xlu0 %203  ;;  %v187_v53 = vsel %vm180_vm3, %v184_v34, %v186_v28  ;;  %v188_v54 = vsel %vm180_vm3, %v186_v28, %v184_v34  ;;  %v715_v28 = vmov 0.0  }
  0xa5   :  { %v193_v60 = vsub.f32 %v188_v54, %v799_v8  ;;  %v194_v61 = vsub.f32 %v187_v53, %v793_v7  ;;  %v913_v29 = vsel %vm145_vm5, 1.0, %v715_v28  ;;  %v915_v30 = vsel %vm146_vm6, 1.0, %v715_v28 }
  0xa6   :  { %v923_v41 = vsel %vm172_vm7, 1.0, %v715_v28  ;;  %v925_v42 = vsel %vm173_vm8, 1.0, %v715_v28 }
  0xa7   :  { %v195_v18 = vand.u32 2147483647, %v193_v60  ;;  %v196_v19 = vand.u32 2147483647, %v194_v61  ;;  %v250_v50 = vperm.slane %v923_v41, 0  ;;  %v251_v51 = vperm.slane %v925_v42, 0 }
  0xa9   :  { %v197_v31 = vadd.f32 %v195_v18, %v191_v16  ;;  %v198_v32 = vadd.f32 %v196_v19, %v192_v17 }
  0xab   :  { %v206_v62 = vpop.permute.xlu1 %205  ;;  %vm199_vm9 = vcmp.eq.f32.partialorder %v197_v31, 1.0  ;;  %vm200_vm10 = vcmp.eq.f32.partialorder %v198_v32, 1.0 }
  0xac   :  { %v213_v63 = vpop.permute.xlu0 %212  ;;  %v208_v5 = vsel %vm207_vm4, %v204_v35, %v206_v62  ;;  %v209_v11 = vsel %vm207_vm4, %v206_v62, %v204_v35  ;;  %v933_v48 = vsel %vm199_vm9, 1.0, %v715_v28  ;;  %v935_v49 = vsel %vm200_vm10, 1.0, %v715_v28 }
  0xad   :  { %v214_v12 = vsel %vm207_vm4, %v211_v43, %v213_v63  ;;  %v215_v13 = vsel %vm207_vm4, %v213_v63, %v211_v43  ;;  %v216_v20 = vsub.f32 %v208_v5, %v801_v9  ;;  %v217_v22 = vsub.f32 %v209_v11, %v791_v6 }
  0xae   :  { %v220_v23 = vsub.f32 %v214_v12, %v799_v8  ;;  %v221_v24 = vsub.f32 %v215_v13, %v793_v7  ;;  %v238_v6 = vperm.slane %v913_v29, 0  ;;  %v239_v8 = vperm.slane %v915_v30, 0 }
  0xaf   :  { %v218_v33 = vand.u32 2147483647, %v216_v20  ;;  %v219_v34 = vand.u32 2147483647, %v217_v22  ;;  %v231_v43 = vmul.f32 -4.0, %v844_v15  ;;  %v262_v53 = vperm.slane %v933_v48, 0 }
  0xb0   :  { %v222_v35 = vand.u32 2147483647, %v220_v23  ;;  %v223_v9 = vand.u32 2147483647, %v221_v24  ;;  %v263_v54 = vperm.slane %v935_v49, 0  ;;  %v358_v24 = vld [vmem:[#allocation5 + $0x8] sm:$0xff] }
  0xb2   :  { %v224_v39 = vadd.f32 %v222_v35, %v218_v33  ;;  %v225_v40 = vadd.f32 %v223_v9, %v219_v34  ;;  %v391_v35 = vld [vmem:[%s1059_s4] sm:$0x3f] }
  0xb4   :  { %vm226_vm11 = vcmp.eq.f32.partialorder %v224_v39, 1.0  ;;  %vm227_vm12 = vcmp.eq.f32.partialorder %v225_v40, 1.0 }
  0xb5   :  { %v953_v63 = vsel %vm226_vm11, 1.0, %v715_v28  ;;  %v955_v2 = vsel %vm227_vm12, 1.0, %v715_v28  ;;  %v357_v28 = vld [vmem:[#allocation5] sm:$0xff] }
  0xb6   :  { %v274_v12 = vperm.slane %v953_v63, 0  ;;  %v275_v13 = vperm.slane %v955_v2, 0 }
  0xe6   :  { %v235_v21 = vpop.permute.xlu2 %234 }
  0xee   :  { %v257_v47 = vpop.permute.xlu2 %256 }
  0xf6   :  { %v271_v11 = vpop.permute.xlu2 %270 }
  0xfd   :  { %v233_v7 = vpop.permute.xlu1 %232  ;;  %v245_v36 = vpop.permute.xlu0 %244 }
  0xfe   :  { %v236_v37 = vsel %vm121_vm1, %v233_v7, %v235_v21  ;;  %v237_v38 = vsel %vm121_vm1, %v235_v21, %v233_v7 }
  0xff   :  { %v240_v45 = vmul.f32 %v238_v6, %v237_v38  ;;  %v241_v46 = vmul.f32 %v239_v8, %v236_v37 }
 0x101   :  { %v242_v15 = vadd.f32 %v240_v45, %v230_v44  ;;  %v243_v52 = vadd.f32 %v241_v46, %v231_v43 }
 0x105   :  { %v247_v14 = vpop.permute.xlu1 %246  ;;  %v259_v55 = vpop.permute.xlu0 %258 }
 0x106   :  { %v248_v56 = vsel %vm153_vm2, %v245_v36, %v247_v14  ;;  %v249_v57 = vsel %vm153_vm2, %v247_v14, %v245_v36  ;;  %v260_v58 = vsel %vm180_vm3, %v257_v47, %v259_v55  ;;  %v261_v59 = vsel %vm180_vm3, %v259_v55, %v257_v47 }
 0x107   :  { %v252_v60 = vmul.f32 %v250_v50, %v248_v56  ;;  %v253_v61 = vmul.f32 %v251_v51, %v249_v57  ;;  %v264_v5 = vmul.f32 %v262_v53, %v261_v59  ;;  %v265_v10 = vmul.f32 %v263_v54, %v260_v58 }
 0x108   :  { %v351_v62 = vpop.f32.mrf.mxu2  ;;  %v716_v59 = vmov 0  }
 0x109   :  { %v254_v3 = vadd.f32 %v252_v60, %v242_v15  ;;  %v255_v4 = vadd.f32 %v253_v61, %v243_v52  ;;  %603 = vset.pattern.permute.xlu0 %v716_v59  ;;  %602 = vset.pattern.permute.xlu2 %v716_v59 }
 0x10a   :  { %604 = vset.pattern.permute.xlu1 %v716_v59 }
 0x10b   :  { %v266_v16 = vadd.f32 %v264_v5, %v254_v3  ;;  %v267_v17 = vadd.f32 %v265_v10, %v255_v4 }
 0x10d   :  { %v269_v18 = vpop.permute.xlu1 %268 }
 0x10e   :  { %v272_v19 = vsel %vm207_vm4, %v269_v18, %v271_v11  ;;  %v273_v20 = vsel %vm207_vm4, %v271_v11, %v269_v18 }
 0x10f   :  { %v276_v21 = vmul.f32 %v274_v12, %v272_v19  ;;  %v277_v22 = vmul.f32 %v275_v13, %v273_v20 }
 0x110   :  { %v354_v23 = vpop.f32.mrf.mxu2 }
 0x111   :  { %380 = vmatpush.msrb.mxu1 %v354_v23  ;;  %589 = vmatpush.msra.mxu3 %v354_v23  ;;  %v971_v26 = vadd.f32 %v276_v21, %v266_v16  ;;  %v973_v27 = vadd.f32 %v277_v22, %v267_v17 }
 0x113   :  { %381 = vmatpush.msrb.mxu1 %v351_v62  ;;  %590 = vmatpush.msra.mxu3 %v351_v62 }
 0x114   :  { %587 = vmatmul.msk.f32.vlgmr.msra.gmra.mxu3 %vm359_vm13, %v358_v24  ;;  %586 = vmatmul.msk.f32.vlgmr.msrb.gmra.mxu1 %vm359_vm13, %v357_v28 }
 0x115   :  { %284 = vrot.lane.b32.xlu1 %v973_v27, %s711_s0  ;;  %282 = vrot.lane.b32.xlu0 %v971_v26, %s711_s0 }
 0x116   :  { %292 = vrot.lane.b32.xlu2 %v971_v26, %s712_s7 }
 0x11d   :  { %302 = vrot.lane.b32.xlu1 %v971_v26, %s713_s23  ;;  %294 = vrot.lane.b32.xlu0 %v973_v27, %s712_s7 }
 0x11e   :  { %304 = vrot.lane.b32.xlu2 %v973_v27, %s713_s23 }
 0x125   :  { %314 = vrot.lane.b32.xlu1 %v973_v27, %s714_s24  ;;  %312 = vrot.lane.b32.xlu0 %v971_v26, %s714_s24 }
 0x191   :  { %v383_v31 = vpop.f32.mrf.mxu1 }
 0x192   :  { %v389_v34 = vmax.f32 %v383_v31, 0.0  ;;  %v415_v31 = vld [vmem:[%s1060_s5] sm:$0x7]  ;;  %s717_s5 = smov [#allocation7]  }
 0x197   :  { %v386_v32 = vpop.f32.mrf.mxu3 }
 0x198   :  { %v390_v33 = vmax.f32 %v386_v32, 0.0  ;;  %v416_v32 = vld [vmem:[%s1061_s6] sm:$0x7]  ;;  %s568_s6 = sshll.u32 %s717_s5, 4  ;;  %s569_s6 = int_to_ptr.vmem [resolvable:$true] %s568_s6 }
 0x19a   :  { %409 = vmatpush.msrb.mxu0 %v390_v33 }
 0x19c   :  { %410 = vmatpush.msrb.mxu0 %v389_v34 }
 0x19d   :  { %588 = vmatmul.msk.f32.vlgmr.msrb.gmra.mxu0 %vm359_vm13, %v391_v35 }
 0x21a   :  { %v412_v9 = vpop.f32.mrf.mxu0 }
 0x21b   :  { %v418_v7 = vsel %vm417_vm14, %v412_v9, -inf  ;;  %v488_v36 = vsel %vm487_vm15, %v412_v9, -inf }
 0x21c   :  { %v419_v37 = vrot.slane %v418_v7, 4  ;;  %v489_v38 = vrot.slane %v488_v36, 4 }
 0x21e   :  { %v420_v39 = vmax.f32 %v418_v7, %v419_v37  ;;  %v490_v40 = vmax.f32 %v488_v36, %v489_v38 }
 0x220   :  { %v421_v43 = vrot.slane %v420_v39, 2  ;;  %v491_v44 = vrot.slane %v490_v40, 2 }
 0x222   :  { %v422_v45 = vmax.f32 %v420_v39, %v421_v43  ;;  %v492_v46 = vmax.f32 %v490_v40, %v491_v44 }
 0x224   :  { %v423_v47 = vrot.slane %v422_v45, 1  ;;  %v493_v15 = vrot.slane %v492_v46, 1 }
 0x226   :  { %v424_v52 = vmax.f32 %v422_v45, %v423_v47  ;;  %v494_v14 = vmax.f32 %v492_v46, %v493_v15 }
 0x228   :  { %v425_v55 = vsub.f32 %v412_v9, %v424_v52  ;;  %v495_v56 = vsub.f32 %v412_v9, %v494_v14 }
 0x22a   :  { %v426_v57 = vmul.f32 1.442695, %v425_v55  ;;  %v496_v58 = vmul.f32 1.442695, %v495_v56 }
 0x22c   :  { %605 = vpow2.f32 %v426_v57 }
 0x22d   :  { %607 = vpow2.f32 %v496_v58 }
 0x232   :  { %v606_v60 = vpop.eup %605 }
 0x233   :  { %v608_v61 = vpop.eup %607  ;;  %v428_v62 = vsel %vm417_vm14, %v606_v60, 0.0 }
 0x234   :  { %v429_v3 = vrot.slane %v428_v62, 4  ;;  %v499_v4 = vrot.slane %v608_v61, 3 }
 0x236   :  { %v430_v5 = vadd.f32 %v429_v3, %v428_v62  ;;  %v501_v10 = vsel %vm417_vm14, %v499_v4, 0.0 }
 0x237   :  { %v502_v11 = vrot.slane %v501_v10, 4 }
 0x238   :  { %v431_v16 = vrot.slane %v430_v5, 2 }
 0x239   :  { %v503_v17 = vadd.f32 %v502_v11, %v501_v10 }
 0x23a   :  { %v432_v18 = vadd.f32 %v431_v16, %v430_v5 }
 0x23b   :  { %v504_v19 = vrot.slane %v503_v17, 2 }
 0x23c   :  { %v433_v20 = vrot.slane %v432_v18, 1 }
 0x23d   :  { %v505_v21 = vadd.f32 %v504_v19, %v503_v17 }
 0x23e   :  { %v434_v22 = vadd.f32 %v433_v20, %v432_v18 }
 0x23f   :  { %v506_v23 = vrot.slane %v505_v21, 1 }
 0x240   :  { %609 = vrcp.f32 %v434_v22  ;;  %v283_v22 = vpop.permute.xlu0 %282 }
 0x241   :  { %v507_v24 = vadd.f32 %v506_v23, %v505_v21  ;;  %v285_v21 = vpop.permute.xlu1 %284  ;;  %v293_v23 = vpop.permute.xlu2 %292 }
 0x243   :  { %611 = vrcp.f32 %v507_v24 }
 0x246   :  { %v610_v28 = vpop.eup %609 }
 0x247   :  { %v436_v33 = vmul.f32 %v610_v28, %v606_v60 }
 0x248   :  { %v295_v28 = vpop.permute.xlu0 %294 }
 0x249   :  { %v612_v34 = vpop.eup %611  ;;  %v437_v35 = vmul.f32 %v436_v33, %v415_v31  ;;  %v445_v9 = vmul.f32 %v436_v33, %v416_v32  ;;  %v303_v24 = vpop.permute.xlu1 %302  ;;  %v281_v33 = vmul.f32 -4.0, %v973_v27 }
 0x24a   :  { %v509_v7 = vmul.f32 %v612_v34, %v608_v61  ;;  %v280_v34 = vmul.f32 -4.0, %v971_v26 }
 0x24b   :  { %v438_v36 = vsel %vm417_vm14, %v437_v35, 0.0  ;;  %v446_v37 = vsel %vm417_vm14, %v445_v9, 0.0 }
 0x24c   :  { %v511_v38 = vrot.slane %v509_v7, 3  ;;  %v439_v39 = vrot.slane %v438_v36, 4  ;;  %v447_v40 = vrot.slane %v446_v37, 4  ;;  %v296_v7 = vsel %vm153_vm2, %v293_v23, %v295_v28 }
 0x24e   :  { %v440_v43 = vadd.f32 %v439_v39, %v438_v36  ;;  %v448_v44 = vadd.f32 %v447_v40, %v446_v37  ;;  %v513_v45 = vmul.f32 %v511_v38, %v415_v31  ;;  %v521_v46 = vmul.f32 %v511_v38, %v416_v32  ;;  %v305_v37 = vpop.permute.xlu2 %304 }
 0x24f   :  { %v286_v31 = vsel %vm121_vm1, %v283_v22, %v285_v21  ;;  %v287_v32 = vsel %vm121_vm1, %v285_v21, %v283_v22  ;;  %v297_v36 = vsel %vm153_vm2, %v295_v28, %v293_v23  ;;  %v298_v40 = vmul.f32 %v296_v7, %v250_v50 }
 0x250   :  { %v441_v47 = vrot.slane %v440_v43, 2  ;;  %v449_v15 = vrot.slane %v448_v44, 2  ;;  %v514_v52 = vsel %vm417_vm14, %v513_v45, 0.0  ;;  %v522_v14 = vsel %vm417_vm14, %v521_v46, 0.0 }
 0x251   :  { %v515_v55 = vrot.slane %v514_v52, 4  ;;  %v523_v56 = vrot.slane %v522_v14, 4  ;;  %v288_v35 = vmul.f32 %v287_v32, %v238_v6  ;;  %v289_v9 = vmul.f32 %v286_v31, %v239_v8  ;;  %v315_v6 = vpop.permute.xlu1 %314  ;;  %v313_v8 = vpop.permute.xlu0 %312 }
 0x252   :  { %v442_v57 = vadd.f32 %v441_v47, %v440_v43  ;;  %v450_v58 = vadd.f32 %v449_v15, %v448_v44  ;;  %v299_v43 = vmul.f32 %v297_v36, %v251_v51  ;;  %v306_v29 = vsel %vm180_vm3, %v303_v24, %v305_v37 }
 0x253   :  { %v516_v59 = vadd.f32 %v515_v55, %v514_v52  ;;  %v524_v60 = vadd.f32 %v523_v56, %v522_v14  ;;  %v290_v38 = vadd.f32 %v288_v35, %v280_v34  ;;  %v291_v39 = vadd.f32 %v289_v9, %v281_v33 }
 0x254   :  { %v443_v61 = vrot.slane %v442_v57, 1  ;;  %v451_v62 = vrot.slane %v450_v58, 1  ;;  %v307_v30 = vsel %vm180_vm3, %v305_v37, %v303_v24  ;;  %v309_v41 = vmul.f32 %v306_v29, %v263_v54 }
 0x255   :  { %v517_v3 = vrot.slane %v516_v59, 2  ;;  %v525_v4 = vrot.slane %v524_v60, 2  ;;  %v300_v44 = vadd.f32 %v298_v40, %v290_v38  ;;  %v301_v45 = vadd.f32 %v299_v43, %v291_v39 }
 0x256   :  { %v444_v5 = vadd.f32 %v443_v61, %v442_v57  ;;  %v452_v10 = vadd.f32 %v451_v62, %v450_v58  ;;  %v308_v46 = vmul.f32 %v307_v30, %v262_v53  ;;  %v316_v42 = vsel %vm207_vm4, %v313_v8, %v315_v6 }
 0x257   :  { %v518_v11 = vadd.f32 %v517_v3, %v516_v59  ;;  %v526_v16 = vadd.f32 %v525_v4, %v524_v60  ;;  %v317_v50 = vsel %vm207_vm4, %v315_v6, %v313_v8  ;;  %v318_v47 = vmul.f32 %v316_v42, %v274_v12 }
 0x258   :  { %455 = vperm.xlu2 %602, %v444_v5   ;;  %462 = vperm.xlu0 %603, %v452_v10   ;;  %v319_v15 = vmul.f32 %v317_v50, %v275_v13  ;;  %v310_v52 = vadd.f32 %v308_v46, %v300_v44  ;;  %v311_v14 = vadd.f32 %v309_v41, %v301_v45 }
 0x259   :  { %v519_v17 = vrot.slane %v518_v11, 1  ;;  %v527_v18 = vrot.slane %v526_v16, 1 }
 0x25a   :  { %v320_v48 = vadd.f32 %v318_v47, %v310_v52  ;;  %v321_v53 = vadd.f32 %v319_v15, %v311_v14 }
 0x25b   :  { %v520_v19 = vadd.f32 %v519_v17, %v518_v11  ;;  %v528_v20 = vadd.f32 %v527_v18, %v526_v16 }
 0x25d   :  { %531 = vperm.xlu1 %604, %v520_v19  }
 0x260   :  { %538 = vperm.xlu2 %602, %v528_v20  }
 0x2b2   :  { %v456_v51 = vpop.permute.xlu2 %455 }
 0x2b3   :  { %v458_v49 = vmul.f32 %v456_v51, %v971_v26  ;;  %v459_v54 = vmul.f32 %v456_v51, %v973_v27 }
 0x2ba   :  { %v539_v25 = vpop.permute.xlu2 %538 }
 0x2bb   :  { %v541_v61 = vmul.f32 %v539_v25, %v320_v48  ;;  %v542_v2 = vmul.f32 %v539_v25, %v321_v53 }
 0x2ca   :  { %v463_v55 = vpop.permute.xlu0 %462 }
 0x2cb   :  { %v465_v56 = vmul.f32 %v463_v55, %v320_v48  ;;  %v466_v57 = vmul.f32 %v463_v55, %v321_v53 }
 0x2cd   :  { %v467_v58 = vadd.f32 %v465_v56, %v458_v49  ;;  %v468_v59 = vadd.f32 %v466_v57, %v459_v54 }
 0x2cf   :  { %v469_v60 = vsub.f32 0.0, %v467_v58  ;;  %v470_v63 = vsub.f32 0.0, %v468_v59  ;;  %v532_v12 = vpop.permute.xlu1 %531 }
 0x2d0   :  { %v534_v13 = vmul.f32 %v532_v12, %v971_v26  ;;  %v535_v62 = vmul.f32 %v532_v12, %v973_v27 }
 0x2d1   :  { %v471_v3 = vmul.f32 1.442695, %v469_v60  ;;  %v473_v4 = vmul.f32 1.442695, %v470_v63 }
 0x2d2   :  { %v543_v5 = vadd.f32 %v541_v61, %v534_v13  ;;  %v544_v10 = vadd.f32 %v542_v2, %v535_v62 }
 0x2d3   :  { %613 = vpow2.f32 %v471_v3 }
 0x2d4   :  { %615 = vpow2.f32 %v473_v4  ;;  %v545_v11 = vsub.f32 0.0, %v543_v5  ;;  %v546_v16 = vsub.f32 0.0, %v544_v10 }
 0x2d6   :  { %v547_v17 = vmul.f32 1.442695, %v545_v11  ;;  %v549_v18 = vmul.f32 1.442695, %v546_v16 }
 0x2d8   :  { %617 = vpow2.f32 %v547_v17 }
 0x2d9   :  { %v614_v19 = vpop.eup %613  ;;  %619 = vpow2.f32 %v549_v18 }
 0x2da   :  { %v616_v20 = vpop.eup %615  ;;  %v475_v21 = vadd.f32 1.0, %v614_v19 }
 0x2db   :  { %v476_v22 = vadd.f32 1.0, %v616_v20 }
 0x2dc   :  { %621 = vrcp.f32 %v475_v21 }
 0x2dd   :  { %623 = vrcp.f32 %v476_v22 }
 0x2de   :  { %v618_v26 = vpop.eup %617 }
 0x2df   :  { %v620_v27 = vpop.eup %619  ;;  %v551_v23 = vadd.f32 1.0, %v618_v26 }
 0x2e0   :  { %v552_v24 = vadd.f32 1.0, %v620_v27 }
 0x2e1   :  { %625 = vrcp.f32 %v551_v23 }
 0x2e2   :  { %v622_v28 = vpop.eup %621  ;;  %627 = vrcp.f32 %v552_v24 }
 0x2e3   :  { %v624_v31 = vpop.eup %623  ;;  %v479_v32 = vadd.f32 1.0, %v622_v28 }
 0x2e4   :  { %v480_v33 = vadd.f32 1.0, %v624_v31 }
 0x2e5   :  { %v481_v34 = vperm.slane %v479_v32, 0 }
 0x2e6   :  { %v482_v35 = vperm.slane %v480_v33, 0 }
 0x2e7   :  { %v626_v9 = vpop.eup %625  ;;  %v483_v7 = vmul.f32 %v481_v34, %v772_v0 }
 0x2e8   :  { %v628_v36 = vpop.eup %627  ;;  %v484_v37 = vmul.f32 %v482_v35, %v777_v1  ;;  %v555_v38 = vadd.f32 1.0, %v626_v9 }
 0x2e9   :  { %485 = vst [vmem:[#allocation7] sm:$0xf] %v483_v7  ;;  %v556_v39 = vadd.f32 1.0, %v628_v36 }
 0x2ea   :  { %486 = vst [vmem:[#allocation7 + $0x8] sm:$0xf] %v484_v37  ;;  %v557_v40 = vperm.slane %v555_v38, 1 }
 0x2eb   :  { %v558_v43 = vperm.slane %v556_v39, 1 }
 0x2ec   :  { %v559_v29 = vmul.f32 %v557_v40, %v772_v0 }
 0x2ed   :  { %v560_v30 = vmul.f32 %v558_v43, %v777_v1 }
 0x2ee   :  { %561 = vst [vmem:[#allocation7] sm:$0xf0] %v559_v29 }
 0x2ef   :  { %562 = vst [vmem:[#allocation7 + $0x8] sm:$0xf0] %v560_v30 }
 0x2f0   :  { %573 = dma.vmem_to_hbm [thread:$0]  %s569_s6, 256, %s571_s13, [#allocation4]  }
 0x2f1   :  { %705 = dma.done.wait [#allocation4], 256  }
 0x2f2   :  { %706 = vsyncadd [#allocation4], 4294967040 }
 0x2f3   :  { %578 = vsyncpa [#allocation3], 1 }
 0x2f4   :  { %579 = vsyncpa [#allocation6], 1 }
 0x2f5   :  { %580 = vsyncpa [#allocation4], 1 }

</bundles_post_ra>
